<compile_context>
chip_gen: v5e
topology: v5e:2x2
jax: 0.10.0
libtpu: 0.0.40
codegen_flags: <defaults>
</compile_context>

<pallas_src>
import functools

import jax
import jax.numpy as jnp
from jax import lax
from jax.experimental import pallas as pl
from jax.experimental.pallas import tpu as pltpu

EPS = 1e-6


def _round_up(x, m):
    return ((x + m - 1) // m) * m


def _pow_static(x, p):
    """x ** p for x > 0 with a static exponent; small integer p stays on the VPU."""
    ip = int(round(p))
    if abs(p - ip) < 1e-9 and 1 <= ip <= 8:
        y = x
        for _ in range(ip - 1):
            y = y * x
        return y
    # TODO(synk): p is a learnable nn.Parameter in GeM; a non-integer / dynamic p needs
    # the exp/log path (2 EUP ops per element of the hot (F, TN) tile) or a dynamic-p
    # kernel variant.
    return jnp.exp(p * jnp.log(x))


def minkloc_kernel(x_ref, w_ref, b_ref, out_ref, *, p, c_pad):
    # x_ref:   VMEM (C_pad + B, TN) bf16 -- rows [0:C_pad]: channels-major features
    #          (zero-padded channels); rows [C_pad:]: per-batch one-hot membership
    #          (padded tail points are all-zero, so they never contribute).
    # w_ref:   VMEM (F, C_pad) f32 -- projection weight (resident)
    # b_ref:   VMEM (F, 1)     f32 -- projection bias   (resident)
    # out_ref: VMEM (1, F, B)  f32 -- this core's running sum of clamp(feat, eps) ** p
    i = pl.program_id(1)

    @pl.when(i == 0)
    def _init():
        out_ref[...] = jnp.zeros_like(out_ref)

    # Single streamed tile; cast to f32 so every dot below is F32 x F32 = F32.
    x = x_ref[...].astype(jnp.float32)                       # (C_pad + B, TN)
    feats = x[:c_pad, :]                                     # (C_pad, TN)
    onehot = x[c_pad:, :]                                    # (B, TN), exact {0, 1}

    # Backbone proxy: per-point 1x1 projection on the MXU (f32 accumulate).
    feat = jnp.dot(w_ref[...], feats,
                   preferred_element_type=jnp.float32) + b_ref[...]      # (F, TN)

    # GeM numerator: clamp(min=eps) ** p (p=3 -> two VPU multiplies, no EUP).
    y = _pow_static(jnp.maximum(feat, EPS), p)                           # (F, TN)

    # MinkowskiGlobalAvgPooling numerator: per-batch masked sums as one MXU contraction
    # over the point/lane dim, then a single full-width (F, B) read-modify-write.
    delta = lax.dot_general(y, onehot, (((1,), (1,)), ((), ())),
                            preferred_element_type=jnp.float32)          # (F, B)
    out_ref[...] += delta[None]


def minkloc_forward(features, coords, W, b, p, batch_size, *,
                    tile_n=32768, core_split=2):
    """features: [N, C_in] f32, coords: [N, 4] i32 (coords[:, 0] = batch idx).
    Returns [batch_size, feature_size] f32 GeM descriptors."""
    N, C_in = features.shape
    F = W.shape[1]
    B = int(batch_size)
    p = float(p)

    C_pad = _round_up(C_in, 8)          # sublane-aligned feature rows
    R = C_pad + B                       # fused feature + one-hot rows

    # Point tiling: TN multiple of 128 (lane-dense); VMEM footprint independent of N.
    TN = min(int(tile_n), _round_up(max(N, 1), 128))
    N_pad = _round_up(max(N, 1), core_split * TN)
    tiles_per_core = N_pad // (core_split * TN)

    # TODO(synk): producing channels-major bf16 features upstream would remove this extra
    # transpose/pad pass over the point cloud (it can rival the kernel's HBM traffic).
    bidx = coords[:, 0].astype(jnp.int32)
    onehot = (bidx[None, :] == jnp.arange(B, dtype=jnp.int32)[:, None])   # (B, N) bool
    x_comb = jnp.concatenate(
        [features.astype(jnp.bfloat16).T,                                 # (C_in, N)
         jnp.zeros((C_pad - C_in, N), jnp.bfloat16),                      # channel pad
         onehot.astype(jnp.bfloat16)],                                    # (B, N)
        axis=0)
    x_comb = jnp.pad(x_comb, ((0, 0), (0, N_pad - N)))   # tail points: all-zero one-hot

    counts = jnp.sum(onehot, axis=1).astype(jnp.float32)                  # (B,) exact

    w_pad = jnp.pad(W.T.astype(jnp.float32), ((0, 0), (0, C_pad - C_in)))  # (F, C_pad)
    b2d = b.astype(jnp.float32).reshape(F, 1)

    # VMEM: one streamed bf16 (R, TN) tile, double-buffered, plus tiny resident params /
    # output block.  Kept well under v7x's 64 MiB.
    tile_bytes = _round_up(R, 16) * TN * 2
    vmem_limit = int(min(max(8 << 20, 2 * tile_bytes + (2 << 20)), 48 << 20))

    partial = pl.pallas_call(
        functools.partial(minkloc_kernel, p=p, c_pad=C_pad),
        out_shape=jax.ShapeDtypeStruct((core_split, F, B), jnp.float32),
        grid_spec=pltpu.PrefetchScalarGridSpec(
            num_scalar_prefetch=0,
            grid=(core_split, tiles_per_core),
            in_specs=[
                pl.BlockSpec((R, TN),
                             lambda c, i: (0, c * tiles_per_core + i)),   # fused stream
                pl.BlockSpec((F, C_pad), lambda c, i: (0, 0)),            # W^T (resident)
                pl.BlockSpec((F, 1), lambda c, i: (0, 0)),                # bias (resident)
            ],
            out_specs=pl.BlockSpec((1, F, B), lambda c, i: (c, 0, 0)),
        ),
        compiler_params=pltpu.CompilerParams(
            dimension_semantics=("parallel", "arbitrary"),   # v7x: one core per partial
            vmem_limit_bytes=vmem_limit,
        ),
    )(x_comb, w_pad, b2d)

    # Tiny epilogue: combine per-core partials, per-batch mean, 1/p root.
    sums = jnp.sum(partial, axis=0)                                       # (F, B)
    avg = sums / jnp.maximum(counts, 1.0)[None, :]                        # guard empties
    return jnp.power(jnp.maximum(avg, 0.0), 1.0 / p).T                    # (B, F)


def reference_forward(features, coords, W, b, p, batch_size):
    """Pure-JAX f32 reference with the module's semantics (backbone proxy + GeM)."""
    feat = features @ W + b[None, :]
    y = jnp.power(jnp.maximum(feat, EPS), p)
    mask = (coords[:, 0][None, :] == jnp.arange(batch_size)[:, None]).astype(jnp.float32)
    counts = jnp.maximum(jnp.sum(mask, axis=1, keepdims=True), 1.0)
    avg = (mask @ y) / counts
    return jnp.power(avg, 1.0 / p)


if __name__ == "__main__":
    # MinkLoc(in_channels=4, feature_size=32, output_dim=32, ...) at small scale.
    batch_size = 2
    n_points = 64          # total points across the sparse batch
    in_channels = 4
    feature_size = 32      # == output_dim (asserted by the module)

    key = jax.random.PRNGKey(0)
    k_feat, k_coord, k_w = jax.random.split(key, 3)

    features = jax.random.normal(k_feat, (n_points, in_channels), dtype=jnp.float32)
    # coords: [batch_idx, x, y, z]; first half batch 0, second half batch 1
    batch_idx = jnp.concatenate([jnp.zeros(n_points // 2, jnp.int32),
                                 jnp.ones(n_points - n_points // 2, jnp.int32)])
    xyz = jax.random.randint(k_coord, (n_points, 3), 0, 16, dtype=jnp.int32)
    coords = jnp.concatenate([batch_idx[:, None], xyz], axis=1)

    # deterministic parameter init (backbone 1x1-conv proxy + GeM p=3)
    W = (jax.random.normal(k_w, (in_channels, feature_size), dtype=jnp.float32)
         * (1.0 / jnp.sqrt(in_channels)))
    b = jnp.zeros((feature_size,), dtype=jnp.float32)
    p = 3.0  # GeM: nn.Parameter(torch.ones(1) * 3)

    fwd = jax.jit(functools.partial(minkloc_forward, p=p, batch_size=batch_size))
    out = jax.block_until_ready(fwd(features, coords, W, b))

    # Reference uses the module's f32 math fed the same bf16-rounded features the kernel
    # streams (W/b stay f32 in both), isolating kernel correctness from the dtype choice.
    f_r = features.astype(jnp.bfloat16).astype(jnp.float32)
    ref = reference_forward(f_r, coords, W, b, p, batch_size)

    assert out.shape == (batch_size, feature_size), out.shape
    max_err = float(jnp.max(jnp.abs(out - ref)))
    assert jnp.allclose(out, ref, rtol=5e-3, atol=1e-4), f"mismatch vs reference: {max_err}"

    print("KERNEL_OK")
</pallas_src>

<mosaic_0001>
module attributes {stable_mosaic.version = 11 : i64} {
  func.func @minkloc_kernel(%arg0: i32, %arg1: i32, %arg2: memref<10x128xbf16, #tpu.memory_space<vmem>>, %arg3: memref<32x8xf32, #tpu.memory_space<vmem>>, %arg4: memref<32x1xf32, #tpu.memory_space<vmem>>, %arg5: memref<1x32x2xf32, #tpu.memory_space<vmem>>) attributes {dimension_semantics = [#tpu.dimension_semantics<parallel>, #tpu.dimension_semantics<arbitrary>], iteration_bounds = array<i64: 2, 1>, scalar_prefetch = 0 : i64, scratch_operands = 0 : i64, tpu.core_type = #tpu.core_type<tc>, window_params = [{transform_indices = @transform_0, window_bounds = array<i64: 10, 128>}, {pipeline_mode = #tpu.pipeline_mode<synchronous>, transform_indices = @transform_1, window_bounds = array<i64: 32, 8>}, {pipeline_mode = #tpu.pipeline_mode<synchronous>, transform_indices = @transform_2, window_bounds = array<i64: 32, 1>}, {transform_indices = @transform_3, window_bounds = array<i64: 1, 32, 2>}]} {
    %c0_i32 = arith.constant 0 : i32
    %0 = arith.cmpi eq, %arg1, %c0_i32 : i32
    %1 = arith.extui %0 : i1 to i32
    %c0_i32_0 = arith.constant 0 : i32
    %2 = arith.cmpi ne, %1, %c0_i32_0 : i32
    scf.if %2 {
      %cst_14 = arith.constant 0.000000e+00 : f32
      %21 = vector.broadcast %cst_14 : f32 to vector<1x32x2xf32>
      %c0_15 = arith.constant 0 : index
      %c0_16 = arith.constant 0 : index
      %c0_17 = arith.constant 0 : index
      %22 = vector.load %arg5[%c0_15, %c0_16, %c0_17] : memref<1x32x2xf32, #tpu.memory_space<vmem>>, vector<1x32x2xf32>
      tpu.vector_store %arg5[%c0_15, %c0_16, %c0_17], %21 {strides = array<i32>} : memref<1x32x2xf32, #tpu.memory_space<vmem>>, vector<1x32x2xf32>,
    } else {
    }
    %c0 = arith.constant 0 : index
    %c0_1 = arith.constant 0 : index
    %3 = vector.load %arg2[%c0, %c0_1] : memref<10x128xbf16, #tpu.memory_space<vmem>>, vector<10x128xbf16>
    %4 = arith.extf %3 : vector<10x128xbf16> to vector<10x128xf32>
    %5 = vector.extract_strided_slice %4 {offsets = [0, 0], sizes = [8, 128], strides = [1, 1]} : vector<10x128xf32> to vector<8x128xf32>
    %6 = vector.extract_strided_slice %4 {offsets = [8, 0], sizes = [2, 128], strides = [1, 1]} : vector<10x128xf32> to vector<2x128xf32>
    %c0_2 = arith.constant 0 : index
    %c0_3 = arith.constant 0 : index
    %7 = vector.load %arg3[%c0_2, %c0_3] : memref<32x8xf32, #tpu.memory_space<vmem>>, vector<32x8xf32>
    %cst = arith.constant dense<0.000000e+00> : vector<32x128xf32>
    %8 = tpu.matmul %7, %5, %cst {dimension_numbers = #tpu.dot_dimension_numbers<[1], [0], [0], [1], [0, 0, 1, 1], [], []>} : vector<32x8xf32>, vector<8x128xf32>, vector<32x128xf32> -> vector<32x128xf32>
    %c0_4 = arith.constant 0 : index
    %c0_5 = arith.constant 0 : index
    %9 = vector.load %arg4[%c0_4, %c0_5] : memref<32x1xf32, #tpu.memory_space<vmem>>, vector<32x1xf32>
    %10 = vector.broadcast %9 : vector<32x1xf32> to vector<32x128xf32>
    %11 = arith.addf %8, %10 : vector<32x128xf32>
    %cst_6 = arith.constant 9.99999997E-7 : f32
    %12 = vector.broadcast %cst_6 : f32 to vector<32x128xf32>
    %13 = arith.maximumf %11, %12 : vector<32x128xf32>
    %14 = arith.mulf %13, %13 : vector<32x128xf32>
    %15 = arith.mulf %14, %13 : vector<32x128xf32>
    %cst_7 = arith.constant dense<0.000000e+00> : vector<32x2xf32>
    %16 = tpu.matmul %15, %6, %cst_7 {dimension_numbers = #tpu.dot_dimension_numbers<[1], [1], [0], [0], [0, 0, 1, 0], [], []>} : vector<32x128xf32>, vector<2x128xf32>, vector<32x2xf32> -> vector<32x2xf32>
    %c0_8 = arith.constant 0 : index
    %c0_9 = arith.constant 0 : index
    %c0_10 = arith.constant 0 : index
    %17 = vector.load %arg5[%c0_8, %c0_9, %c0_10] : memref<1x32x2xf32, #tpu.memory_space<vmem>>, vector<1x32x2xf32>
    %18 = vector.shape_cast %16 : vector<32x2xf32> to vector<1x32x2xf32>
    %19 = arith.addf %17, %18 : vector<1x32x2xf32>
    %c0_11 = arith.constant 0 : index
    %c0_12 = arith.constant 0 : index
    %c0_13 = arith.constant 0 : index
    %20 = vector.load %arg5[%c0_11, %c0_12, %c0_13] : memref<1x32x2xf32, #tpu.memory_space<vmem>>, vector<1x32x2xf32>
    tpu.vector_store %arg5[%c0_11, %c0_12, %c0_13], %19 {strides = array<i32>} : memref<1x32x2xf32, #tpu.memory_space<vmem>>, vector<1x32x2xf32>,
    return
  }
  func.func @transform_0(%arg0: i32, %arg1: i32) -> (i32, i32) {
    %c1_i32 = arith.constant 1 : i32
    %0 = arith.muli %arg0, %c1_i32 : i32
    %1 = arith.addi %0, %arg1 : i32
    %c0_i32 = arith.constant 0 : i32
    %c0_i32_0 = arith.constant 0 : i32
    return %c0_i32, %1 : i32, i32
  }
  func.func @transform_1(%arg0: i32, %arg1: i32) -> (i32, i32) {
    %c0_i32 = arith.constant 0 : i32
    %c0_i32_0 = arith.constant 0 : i32
    %c0_i32_1 = arith.constant 0 : i32
    return %c0_i32, %c0_i32_0 : i32, i32
  }
  func.func @transform_2(%arg0: i32, %arg1: i32) -> (i32, i32) {
    %c0_i32 = arith.constant 0 : i32
    %c0_i32_0 = arith.constant 0 : i32
    %c0_i32_1 = arith.constant 0 : i32
    return %c0_i32, %c0_i32_0 : i32, i32
  }
  func.func @transform_3(%arg0: i32, %arg1: i32) -> (i32, i32, i32) {
    %c0_i32 = arith.constant 0 : i32
    %c0_i32_0 = arith.constant 0 : i32
    %c0_i32_1 = arith.constant 0 : i32
    return %arg0, %c0_i32, %c0_i32_0 : i32, i32, i32
  }
}

</mosaic_0001>

<bundles_post_ra>
// kernel: minkloc_forward.1
= control target key start
LH: loop header
LB: loop body
LE: loop exit
PB: predicated region body
PF: predicated region fallthrough
CT: control target
= control target key end

     0   :  { %s566_s12 = smov 0   ;;  %s568_s13 = smov 0   ;;  %s678_s0 = inlined_call_operand.vmem [shape: bf16[10,256], index: 0, kind: input, shape index: {}]   ;;  %s679_s1 = inlined_call_operand.vmem [shape: f32[32,8], index: 1, kind: input, shape index: {}]   ;;  %s680_s2 = inlined_call_operand.vmem [shape: f32[32,1], index: 2, kind: input, shape index: {}]   ;;  %s681_s3 = inlined_call_operand.vmem [shape: f32[2,32,2], index: 3, kind: output, shape index: {}]  }
   0x1   :  { %s570_s14 = smov 0   ;;  %s572_s15 = smov 0  }
   0x2   :  { %s574_s16 = smov 0  }
   0x3 LB: > { %s25_s17 = sadd.s32 1, %s538_s15  ;;  %p41_p1 = scmp.ne.s32.totalorder %s530_s13, %s526_s12  ;;  %s542_s16 = sphi %s574_s16, %s13_s16   ;;  %s538_s15 = sphi %s572_s15, %s685_s15   ;;  %s534_s14 = sphi %s570_s14, %s684_s14   ;;  %s530_s13 = sphi %s568_s13, %s683_s13   ;;  %s526_s12 = sphi %s566_s12, %s682_s12  }
   0x4   : > { %p27_p0 = scmp.ge.s32.totalorder %s25_s17, 2  ;;  %p42_p2 = scmp.eq.s32.totalorder %s542_s16, 0 }
   0x5   : > { %s34_s19 = sadd.s32 1, %s530_s13  ;;  %p444_p5 = scmp.ge.s32.totalorder %s542_s16, 2 }
   0x6   : > { %s687_s17 = smov (%p27_p0, %s25_s17), 0  ;;  %p43_p3 = por %p42_p2, %p41_p1 }
   0x7   : > { %s31_s18 = ssub.s32 %s538_s15, %s687_s17  ;;  %141 = sbr.rel (%p444_p5) target bundleno = 18 (0x12), region = 24 }
   0x8   : > { %p32_p4 = scmp.eq.s32.totalorder %s31_s18, 0 }
   0xa   : > { %s601_s20 = scalar_select %p32_p4, %s530_s13, %s34_s19  }
   0xc   : > { %144 = sbr.rel (!%p43_p3) target bundleno = 18 (0x12), region = 28  ;;  %s146_s21 = sand.u32 (%p43_p3), 1, %s530_s13  }
   0xd   : > { %s446_s22 = sshll.u32 (%p43_p3), %s538_s15, 2  ;;  %s445_s23 = sshll.u32 (%p43_p3), %s146_s21, 3 }
   0xe   : > { %s151_s26 = scalar_lea.vmem (%p43_p3), %s678_s0, %s446_s22  ;;  %s148_s27 = scalar_lea.vmem (%p43_p3), [#allocation2], %s445_s23 }
   0xf   : > { %v168_v0 = vld [vmem:[%s151_s26] sm:$0xf] (%p43_p3)  ;;  %v170_v1 = vld [vmem:[%s151_s26 + $0x8] sm:$0xf] (%p43_p3) }
  0x10   : > { %169 = vst [vmem:[%s148_s27] sm:$0xf] (%p43_p3), %v168_v0 }
  0x11   : > { %171 = vst [vmem:[%s148_s27 + $0x4] sm:$0xf] %v170_v1 }
  0x12 PF: > { %p447_p6 = scmp.ge.s32.totalorder %s542_s16, 1  ;;  %p198_p7 = scmp.lt.s32.totalorder %s542_s16, 3 }
  0x14   : > { %p199_p8 = pnand %p447_p6, %p198_p7 }
  0x15   : > { %s205_s28 = sand.u32 (!%p199_p8), 1, %s526_s12   ;;  %p229_p9 = scmp.lt.s32.totalorder (!%p199_p8), %s534_s14, 1 }
  0x16   : > { %202 = sbr.rel (%p199_p8) target bundleno = 322 (0x142), region = 69  ;;  %s448_s4 = sshll.u32 (!%p199_p8), %s205_s28, 3 }
  0x17   : > { %s207_s7 = scalar_lea.vmem (!%p199_p8), [#allocation2], %s448_s4 }
  0x1b   : > { %v253_v2 = vld [vmem:[%s680_s2 + $0x10] sm:$0xff]  ;;  %v544_v3 = vmov 0   ;;  %v254_v4 = vld [vmem:[%s680_s2 + $0x18] sm:$0xff]  ;;  %v243_v5 = vld [vmem:[%s207_s7] sm:$0xf]  ;;  %vm275_vm0 = vcmask 64512  }
  0x1c   : > { %502 = vset.pattern.permute.xlu0 %v544_v3  ;;  %503 = vset.pattern.permute.xlu1 %v544_v3  ;;  %v245_v6 = vunpack.c.l.bf16 %v243_v5  ;;  %v247_v7 = vld [vmem:[%s679_s1] sm:$0xff]  ;;  %v248_v8 = vld [vmem:[%s679_s1 + $0x8] sm:$0xff]  ;;  %v249_v11 = vld [vmem:[%s679_s1 + $0x10] sm:$0xff]  ;;  %s689_s14 = smov (!%p229_p9, %s534_s14), 1  ;;  %vm238_vm1 = vcmask 15360   ;;  %v545_v19 = vmov 0.0  }
  0x1d   : > { %267 = vperm.xlu0 %502, %v253_v2   ;;  %272 = vperm.xlu1 %503, %v254_v4   ;;  %v251_v9 = vld [vmem:[%s680_s2] sm:$0xff]  ;;  %v252_v10 = vld [vmem:[%s680_s2 + $0x8] sm:$0xff]  ;;  %v250_v12 = vld [vmem:[%s679_s1 + $0x18] sm:$0xff]  ;;  %s457_s26 = sshll.u32 %s689_s14, 5 }
  0x1e   : > { %303 = vmatpush.msra.mxu0 %v245_v6  ;;  %458 = vmatpush.msra.mxu3 %v245_v6  ;;  %v244_v13 = vld [vmem:[%s207_s7 + $0x4] sm:$0x1]  ;;  %s641_s29 = scalar_lea.vmem %s681_s3, %s457_s26 }
  0x1f   : > { %451 = vmatmul.msk.f32.vlgmr.msra.gmra.mxu0 %vm275_vm0, %v247_v7  ;;  %452 = vmatmul.msk.f32.vlgmr.msra.gmra.mxu3 %vm275_vm0, %v248_v8  ;;  %v246_v14 = vunpack.c.l.bf16 %v244_v13  ;;  %239 = vst.msk [vmem:[%s641_s29] sm:$0xff] %vm238_vm1, %v545_v19 }
  0x20   : > { %240 = vst.msk [vmem:[%s641_s29 + $0x8] sm:$0xff] %vm238_vm1, %v545_v19 }
  0x21   : > { %344 = vmatpush.xpose.msra.mxu1 %v246_v14  ;;  %459 = vmatpush.xpose.msra.mxu2 %v246_v14  ;;  %241 = vst.msk [vmem:[%s641_s29 + $0x10] sm:$0xff] %vm238_vm1, %v545_v19 }
  0x22   : > { %242 = vst.msk [vmem:[%s641_s29 + $0x18] sm:$0xff] %vm238_vm1, %v545_v19 }
  0x25   : > { %257 = vperm.xlu0 %502, %v251_v9   ;;  %262 = vperm.xlu1 %503, %v252_v10  }
  0x26   : > { %v358_v40 = vld [vmem:[%s641_s29] sm:$0xff] }
  0x27   : > { %453 = vmatmul.msk.f32.gmra.mxu3 %vm275_vm0, %v249_v11  ;;  %v359_v43 = vld [vmem:[%s641_s29 + $0x8] sm:$0xff] }
  0x28   : > { %v360_v46 = vld [vmem:[%s641_s29 + $0x10] sm:$0xff] }
  0x29   : > { %v361_v49 = vld [vmem:[%s641_s29 + $0x18] sm:$0xff] }
  0x2f   : > { %454 = vmatmul.msk.f32.gmra.mxu3 %vm275_vm0, %v250_v12 }
  0x8f   : > { %v268_v15 = vpop.permute.xlu0 %267  ;;  %v273_v16 = vpop.permute.xlu1 %272 }
  0x97   : > { %v258_v17 = vpop.permute.xlu0 %257  ;;  %v263_v22 = vpop.permute.xlu1 %262 }
  0x9c   : > { %v305_v18 = vpop.f32.mrf.mxu0 }
  0x9d   : > { %v306_v20 = vadd.f32 %v305_v18, %v258_v17 }
  0x9f   : > { %v317_v21 = vmax.f32 %v306_v20, 1e-06 }
  0xa1   : > { %v321_v23 = vmul.f32 %v317_v21, %v317_v21 }
  0xa2   : > { %v308_v24 = vpop.f32.mrf.mxu3 }
  0xa3   : > { %v309_v25 = vadd.f32 %v308_v24, %v263_v22  ;;  %v325_v26 = vmul.f32 %v321_v23, %v317_v21 }
  0xa5   : > { %v318_v27 = vmax.f32 %v309_v25, 1e-06  ;;  %345 = vmatmul.f32.vlgmr.msra.gmra.mxu1 %v325_v26 }
  0xa7   : > { %v322_v28 = vmul.f32 %v318_v27, %v318_v27 }
  0xa9   : > { %v326_v31 = vmul.f32 %v322_v28, %v318_v27 }
  0xaa   : > { %v311_v29 = vpop.f32.mrf.mxu3 }
  0xab   : > { %v312_v30 = vadd.f32 %v311_v29, %v268_v15 }
  0xad   : > { %v319_v32 = vmax.f32 %v312_v30, 1e-06  ;;  %348 = vmatmul.f32.gmra.mxu1 %v326_v31 }
  0xaf   : > { %v323_v33 = vmul.f32 %v319_v32, %v319_v32 }
  0xb1   : > { %v327_v34 = vmul.f32 %v323_v33, %v319_v32 }
  0xb2   : > { %v314_v35 = vpop.f32.mrf.mxu3 }
  0xb3   : > { %v315_v36 = vadd.f32 %v314_v35, %v273_v16  ;;  %351 = vmatmul.f32.vlgmr.msra.gmra.mxu2 %v327_v34 }
  0xb5   : > { %v320_v37 = vmax.f32 %v315_v36, 1e-06 }
  0xb7   : > { %v324_v38 = vmul.f32 %v320_v37, %v320_v37 }
  0xb9   : > { %v328_v39 = vmul.f32 %v324_v38, %v320_v37 }
  0xbb   : > { %354 = vmatmul.f32.gmra.mxu2 %v328_v39 }
 0x122   : > { %v346_v41 = vpop.f32.mrf.mxu1 }
 0x123   : > { %v362_v42 = vadd.f32 %v358_v40, %v346_v41 }
 0x125   : > { %367 = vst.msk [vmem:[%s641_s29] sm:$0xff] %vm238_vm1, %v362_v42 }
 0x12a   : > { %v349_v44 = vpop.f32.mrf.mxu1 }
 0x12b   : > { %v363_v45 = vadd.f32 %v359_v43, %v349_v44 }
 0x12d   : > { %368 = vst.msk [vmem:[%s641_s29 + $0x8] sm:$0xff] %vm238_vm1, %v363_v45 }
 0x136   : > { %v352_v47 = vpop.f32.mrf.mxu2 }
 0x137   : > { %v364_v48 = vadd.f32 %v360_v46, %v352_v47 }
 0x139   : > { %369 = vst.msk [vmem:[%s641_s29 + $0x10] sm:$0xff] %vm238_vm1, %v364_v48 }
 0x13e   : > { %v355_v50 = vpop.f32.mrf.mxu2 }
 0x13f   : > { %v365_v51 = vadd.f32 %v361_v49, %v355_v50 }
 0x141   : > { %370 = vst.msk [vmem:[%s641_s29 + $0x18] sm:$0xff] %vm238_vm1, %v365_v51 }
 0x142 PF: > { %s13_s16 = sadd.s32 1, %s542_s16   ;;  %s682_s12 = smov %s530_s13 }
 0x143   : > { %p10_p10 = scmp.ge.s32.totalorder %s13_s16, 4   ;;  %s683_s13 = smov %s601_s20 }
 0x144   : > { %s684_s14 = smov %s538_s15  ;;  %s685_s15 = smov %s687_s17 }
 0x145   :  { %12 = sbr.rel (!%p10_p10) target bundleno = 3 (0x3), region = 112 }

</bundles_post_ra>
